<compile_context>
chip_gen: v6e
topology: v6e:2x2x1
jax: 0.10.0
libtpu: 0.0.40
codegen_flags: <defaults>
</compile_context>

<pallas_src>
import functools

import jax
import jax.numpy as jnp
from jax.experimental import pallas as pl
from jax.experimental.pallas import tpu as pltpu


def _vq_kernel(z_ref, e_ref, et_ref, hesq_ref, zq_ref, idx_ref, loss_ref,
               *scratch, n_chunks, chunk_n):
    """One lane-dense token tile against one codebook chunk.

    z_ref:    (C, T)        VMEM  — channels on sublanes, tokens on lanes
    e_ref:    (chunk_n, C)  VMEM  — codebook chunk
    et_ref:   (C, chunk_n)  VMEM  — codebook chunk transposed
    hesq_ref: (chunk_n, 1)  VMEM  — 0.5*|e|^2 per code (hoisted into wrapper)
    zq_ref:   (C, T)        VMEM out
    idx_ref:  (1, T)        VMEM out (int32 codebook indices, lane-dense)
    loss_ref: (1, T)        VMEM out (per-token sum_c (z_q - z)^2, lane-dense)
    scratch (only when n_chunks > 1): mind (1,T) f32, bidx (1,T) i32, bzq (C,T) f32
    """
    z = z_ref[...].astype(jnp.float32)          # (C, T)
    e = e_ref[...].astype(jnp.float32)          # (cn, C)
    e_t = et_ref[...].astype(jnp.float32)       # (C, cn)
    hesq = hesq_ref[...].astype(jnp.float32)    # (cn, 1)

    # Half-distance: argmin_j (|e_j|^2 + |z_t|^2 - 2 e_j.z_t) == argmin_j (0.5|e_j|^2 - e_j.z_t)
    cross = jnp.dot(e, z, preferred_element_type=jnp.float32)        # (cn, T)  MXU
    d = hesq - cross                                                 # (cn, T)

    # argmin over the (chunked) codebook axis, first-occurrence tie-break
    d_min = jnp.min(d, axis=0, keepdims=True)                        # (1, T)
    code_iota = jax.lax.broadcasted_iota(jnp.int32, d.shape, 0)      # (cn, T)
    masked = jnp.where(d == d_min, code_iota, chunk_n)
    loc = jnp.min(masked, axis=0, keepdims=True)                     # (1, T) int32 (chunk-local)

    # gather codebook rows via one-hot matmul; reuse the winner mask directly
    onehot = (masked == loc).astype(jnp.float32)                     # (cn, T)
    zq_c = jnp.dot(e_t, onehot, preferred_element_type=jnp.float32)  # (C, T)   MXU

    if n_chunks == 1:
        zq_ref[...] = zq_c.astype(zq_ref.dtype)
        idx_ref[...] = loc
        diff = zq_c - z
        loss_ref[...] = jnp.sum(diff * diff, axis=0, keepdims=True)  # (1, T) per-token partials
    else:
        mind_sc, bidx_sc, bzq_sc = scratch
        k = pl.program_id(2)

        @pl.when(k == 0)
        def _():
            mind_sc[...] = jnp.full(mind_sc.shape, jnp.inf, jnp.float32)
            bidx_sc[...] = jnp.zeros(bidx_sc.shape, jnp.int32)
            bzq_sc[...] = jnp.zeros(bzq_sc.shape, jnp.float32)

        # strict '<' keeps the earlier chunk on exact ties -> global first-occurrence argmin
        better = d_min < mind_sc[...]                                # (1, T) bool
        mind_sc[...] = jnp.where(better, d_min, mind_sc[...])
        bidx_sc[...] = jnp.where(better, loc + k * chunk_n, bidx_sc[...])
        bzq_sc[...] = jnp.where(better, zq_c, bzq_sc[...])

        @pl.when(k == n_chunks - 1)
        def _():
            zq = bzq_sc[...]
            zq_ref[...] = zq.astype(zq_ref.dtype)
            idx_ref[...] = bidx_sc[...]
            diff = zq - z
            loss_ref[...] = jnp.sum(diff * diff, axis=0, keepdims=True)


def _vmem_capacity_bytes():
    """Physical per-core VMEM; conservative fallback if the query is unavailable."""
    try:
        info = pltpu.get_tpu_info()
        cap = getattr(info, "vmem_capacity_bytes", None)
        if cap:
            return int(cap)
    except Exception:  # pragma: no cover
        pass
    return 64 * 1024 * 1024  # v7x is the smallest (64 MiB); safe everywhere


def _vmem_estimate(c, t, chunk_n, n_chunks):
    """Static VMEM estimate (bytes) for a (token-tile T, codebook-chunk) choice."""
    cb_buf = 1 if n_chunks == 1 else 2                      # consts single-buffered when resident
    io = 2 * 2 * (c * t * 4)                                # z in + zq out, double-buffered
    io += 2 * 2 * (t * 4)                                   # idx + loss tiles, double-buffered
    book = cb_buf * (2 * chunk_n * c + chunk_n) * 4         # e, e^T, 0.5|e|^2
    scratch = 0 if n_chunks == 1 else (8 * t + 4 * c * t)   # mind + bidx + bzq
    inter = 6 * chunk_n * t * 4                             # cross/d/masked/onehot + headroom
    return io + book + scratch + inter


def _t_candidates(hw, max_tile_hw):
    if hw % 128 != 0:
        return [hw]                    # full-extent block (allowed when == array dim)
    cands = []
    t = (min(max_tile_hw, hw) // 128) * 128
    while t >= 128:
        if hw % t == 0:
            cands.append(t)
        t -= 128
    return cands or [hw]


def _chunk_candidates(n_e):
    cands = [n_e]                      # prefer the whole codebook resident
    if n_e % 128 == 0:
        cn = ((n_e - 1) // 128) * 128
        while cn >= 128:
            if n_e % cn == 0:
                cands.append(cn)
            cn -= 128
    return cands


def _pick_tiling(hw, n_e, c, budget, max_tile_hw):
    """Largest lane-dense token tile first; chunk the codebook only if needed."""
    fallback = None
    for t in _t_candidates(hw, max_tile_hw):
        for cn in _chunk_candidates(n_e):
            est = _vmem_estimate(c, t, cn, n_e // cn)
            if est <= budget:
                return t, cn, est
            if fallback is None or est < fallback[2]:
                fallback = (t, cn, est)
    return fallback                    # nothing fits the budget: take the smallest footprint


def _const_spec(block_shape, index_map, single_buffer):
    """BlockSpec for a constant-index codebook input; single-buffer when resident."""
    if single_buffer:
        try:
            return pl.BlockSpec(block_shape, index_map, pipeline_mode=pl.Buffered(1))
        except Exception:  # pragma: no cover - older jax without pipeline_mode
            pass
    return pl.BlockSpec(block_shape, index_map)


@functools.partial(jax.jit, static_argnames=("beta", "max_tile_hw"))
def vector_quantizer_forward(z, embedding, *, beta=0.25, max_tile_hw=4096):
    """Forward of VectorQuantizer.

    z:         (B, C, H, W) float32, C == e_dim   (NCHW, PyTorch convention)
    embedding: (n_e, e_dim) float32 codebook

    Returns (z_q (B,C,H,W), loss scalar, (None, None, min_encoding_indices (B*H*W,)))
    """
    B, C, H, W = z.shape
    n_e, e_dim = embedding.shape
    assert C == e_dim, "channel dim must equal e_dim"
    HW = H * W

    cap = _vmem_capacity_bytes()
    budget = int(cap * 0.75)                       # generation-aware: ~96 MiB v5e/v6e, ~48 MiB v7x
    tile, chunk_n, est = _pick_tiling(HW, n_e, C, budget, max_tile_hw)
    num_t = HW // tile
    n_chunks = n_e // chunk_n
    grid = (B, num_t, n_chunks)
    single_buf_consts = (n_chunks == 1)

    # Free reshapes only — z stays in NCHW memory order (no transposes).
    z3 = z.reshape(B, C, HW)
    e = embedding.astype(jnp.float32)
    e_t = e.T                                      # (C, n_e), tiny, once per call
    half_e_sq = 0.5 * jnp.sum(e * e, axis=1, keepdims=True)   # (n_e, 1)

    vmem_limit = int(min(int(cap * 0.90), max(2 * est, 16 * 1024 * 1024)))

    in_specs = [
        pl.BlockSpec((None, C, tile), lambda b, t, k: (b, 0, t)),            # z tile (C x tokens)
        _const_spec((chunk_n, C), lambda b, t, k: (k, 0), single_buf_consts),  # codebook chunk
        _const_spec((C, chunk_n), lambda b, t, k: (0, k), single_buf_consts),  # codebook^T chunk
        _const_spec((chunk_n, 1), lambda b, t, k: (k, 0), single_buf_consts),  # 0.5|e|^2 chunk
    ]
    out_specs = (
        pl.BlockSpec((None, C, tile), lambda b, t, k: (b, 0, t)),   # z_q
        pl.BlockSpec((None, 1, tile), lambda b, t, k: (b, 0, t)),   # indices (lane-dense)
        pl.BlockSpec((None, 1, tile), lambda b, t, k: (b, 0, t)),   # per-token loss partials
    )
    out_shape = (
        jax.ShapeDtypeStruct((B, C, HW), z.dtype),
        jax.ShapeDtypeStruct((B, 1, HW), jnp.int32),
        jax.ShapeDtypeStruct((B, 1, HW), jnp.float32),
    )
    scratch_shapes = [] if n_chunks == 1 else [
        pltpu.VMEM((1, tile), jnp.float32),   # running min half-distance
        pltpu.VMEM((1, tile), jnp.int32),     # running argmin (global code id)
        pltpu.VMEM((C, tile), jnp.float32),   # running gathered z_q
    ]

    kernel = functools.partial(_vq_kernel, n_chunks=n_chunks, chunk_n=chunk_n)

    zq3, idx3, loss_tok = pl.pallas_call(
        kernel,
        out_shape=out_shape,
        grid_spec=pltpu.PrefetchScalarGridSpec(
            num_scalar_prefetch=0,
            grid=grid,
            in_specs=in_specs,
            out_specs=out_specs,
            scratch_shapes=scratch_shapes,
        ),
        compiler_params=pltpu.CompilerParams(
            # batch and token-tile axes are fully independent; codebook-chunk axis is
            # a reduction with resident scratch -> "arbitrary" (and it is innermost).
            dimension_semantics=("parallel", "parallel", "arbitrary"),
            vmem_limit_bytes=vmem_limit,
        ),
    )(z3, e, e_t, half_e_sq)

    # legacy / non-legacy losses are numerically identical in the forward pass:
    # (1 + beta) * mean((z_q - z)^2); per-token partials are tree-reduced here.
    loss = (1.0 + beta) * jnp.sum(loss_tok) / jnp.float32(B * HW * C)

    # straight-through: z + (z_q - z).detach() == z_q numerically
    z_q = zq3.reshape(B, C, H, W)                  # free reshape, already NCHW
    min_encoding_indices = idx3.reshape(-1)        # order b, h*W + w == torch flattening

    # TODO(synk): remap_to_used / unmap_to_all / sane_index_shape paths (remap=None
    # default; remap requires np.load of external indices + torch.randint) are not translated.
    return z_q, loss, (None, None, min_encoding_indices)


def _reference_forward(z, embedding, beta):
    """Pure-JAX reference mirroring the PyTorch forward."""
    B, C, H, W = z.shape
    zf = jnp.transpose(z, (0, 2, 3, 1)).reshape(-1, C)
    d = (jnp.sum(zf ** 2, axis=1, keepdims=True)
         + jnp.sum(embedding ** 2, axis=1)
         - 2.0 * zf @ embedding.T)
    idx = jnp.argmin(d, axis=1)
    z_q = embedding[idx]
    loss = (1.0 + beta) * jnp.mean((z_q - zf) ** 2)
    z_q = jnp.transpose(z_q.reshape(B, H, W, C), (0, 3, 1, 2))
    return z_q, loss, idx, d


if __name__ == "__main__":
    # Module hyper-params (small, consistent with the forward pass)
    n_e = 64        # codebook size
    e_dim = 8       # embedding dim == channels
    beta = 0.25
    B, H, W = 2, 16, 16   # N = 512 tokens

    key = jax.random.PRNGKey(0)
    k_z, k_e = jax.random.split(key)

    # Deterministic init: embedding.weight ~ U(-1/n_e, 1/n_e)
    embedding = jax.random.uniform(
        k_e, (n_e, e_dim), dtype=jnp.float32,
        minval=-1.0 / n_e, maxval=1.0 / n_e)
    z = jax.random.normal(k_z, (B, e_dim, H, W), dtype=jnp.float32)

    z_q, loss, (_, _, inds) = vector_quantizer_forward(z, embedding, beta=beta)
    jax.block_until_ready((z_q, loss, inds))

    # --- checks against a pure-JAX reference mirroring the PyTorch forward ---
    z_q_ref, loss_ref, inds_ref, d_ref = _reference_forward(z, embedding, beta)
    assert z_q.shape == (B, e_dim, H, W)
    assert inds.shape == (B * H * W,)

    inds = inds.astype(jnp.int32)
    inds_ref = inds_ref.astype(jnp.int32)

    # Indices: expect exact match; tolerate only fp near-ties (different, but
    # equally-near, codes) since the kernel uses the algebraically-trimmed
    # half-distance 0.5|e|^2 - e.z instead of the full expansion.
    rows = jnp.arange(d_ref.shape[0])
    gap = d_ref[rows, inds] - d_ref[rows, inds_ref]   # >= 0 by construction
    n_mismatch = int(jnp.sum(inds != inds_ref))
    assert n_mismatch == 0 or bool(jnp.all(gap <= 1e-5)), "kernel picked a non-nearest code"

    # z_q must be exactly the codebook rows the kernel selected.
    zf = jnp.transpose(z, (0, 2, 3, 1)).reshape(-1, e_dim)
    zq_sel = jnp.transpose(embedding[inds].reshape(B, H, W, e_dim), (0, 3, 1, 2))
    assert jnp.allclose(z_q, zq_sel, atol=1e-6, rtol=1e-6)
    if n_mismatch == 0:
        assert jnp.allclose(z_q, z_q_ref, atol=1e-5, rtol=1e-5)

    # Loss: consistent with the kernel's own assignment and with the reference.
    loss_sel = (1.0 + beta) * jnp.mean((embedding[inds] - zf) ** 2)
    assert jnp.allclose(loss, loss_sel, atol=1e-6, rtol=1e-5)
    assert jnp.allclose(loss, loss_ref, atol=1e-5, rtol=1e-4)

    print("KERNEL_OK")
</pallas_src>

<mosaic_0001>
module attributes {stable_mosaic.version = 11 : i64} {
  func.func @_vq_kernel(%arg0: i32, %arg1: i32, %arg2: i32, %arg3: memref<1x8x256xf32, #tpu.memory_space<vmem>>, %arg4: memref<64x8xf32, #tpu.memory_space<vmem>>, %arg5: memref<8x64xf32, #tpu.memory_space<vmem>>, %arg6: memref<64x1xf32, #tpu.memory_space<vmem>>, %arg7: memref<1x8x256xf32, #tpu.memory_space<vmem>>, %arg8: memref<1x1x256xi32, #tpu.memory_space<vmem>>, %arg9: memref<1x1x256xf32, #tpu.memory_space<vmem>>) attributes {dimension_semantics = [#tpu.dimension_semantics<parallel>, #tpu.dimension_semantics<parallel>, #tpu.dimension_semantics<arbitrary>], iteration_bounds = array<i64: 2, 1, 1>, scalar_prefetch = 0 : i64, scratch_operands = 0 : i64, tpu.core_type = #tpu.core_type<tc>, window_params = [{transform_indices = @transform_0, window_bounds = array<i64: 1, 8, 256>}, {pipeline_mode = #tpu.pipeline_mode<synchronous>, transform_indices = @transform_1, window_bounds = array<i64: 64, 8>}, {pipeline_mode = #tpu.pipeline_mode<synchronous>, transform_indices = @transform_2, window_bounds = array<i64: 8, 64>}, {pipeline_mode = #tpu.pipeline_mode<synchronous>, transform_indices = @transform_3, window_bounds = array<i64: 64, 1>}, {transform_indices = @transform_4, window_bounds = array<i64: 1, 8, 256>}, {transform_indices = @transform_5, window_bounds = array<i64: 1, 1, 256>}, {transform_indices = @transform_6, window_bounds = array<i64: 1, 1, 256>}]} {
    %c0 = arith.constant 0 : index
    %c0_0 = arith.constant 0 : index
    %c0_1 = arith.constant 0 : index
    %0 = vector.load %arg3[%c0, %c0_0, %c0_1] : memref<1x8x256xf32, #tpu.memory_space<vmem>>, vector<1x8x256xf32>
    %1 = vector.shape_cast %0 : vector<1x8x256xf32> to vector<8x256xf32>
    %c0_2 = arith.constant 0 : index
    %c0_3 = arith.constant 0 : index
    %2 = vector.load %arg4[%c0_2, %c0_3] : memref<64x8xf32, #tpu.memory_space<vmem>>, vector<64x8xf32>
    %c0_4 = arith.constant 0 : index
    %c0_5 = arith.constant 0 : index
    %3 = vector.load %arg5[%c0_4, %c0_5] : memref<8x64xf32, #tpu.memory_space<vmem>>, vector<8x64xf32>
    %c0_6 = arith.constant 0 : index
    %c0_7 = arith.constant 0 : index
    %4 = vector.load %arg6[%c0_6, %c0_7] : memref<64x1xf32, #tpu.memory_space<vmem>>, vector<64x1xf32>
    %cst = arith.constant dense<0.000000e+00> : vector<64x256xf32>
    %5 = tpu.matmul %2, %1, %cst {dimension_numbers = #tpu.dot_dimension_numbers<[1], [0], [0], [1], [0, 0, 1, 1], [], []>} : vector<64x8xf32>, vector<8x256xf32>, vector<64x256xf32> -> vector<64x256xf32>
    %6 = vector.broadcast %4 : vector<64x1xf32> to vector<64x256xf32>
    %7 = arith.subf %6, %5 : vector<64x256xf32>
    %cst_8 = arith.constant dense<0x7F800000> : vector<256xf32>
    %8 = vector.multi_reduction <minimumf>, %7, %cst_8 [0] : vector<64x256xf32> to vector<256xf32>
    %9 = vector.shape_cast %8 : vector<256xf32> to vector<1x256xf32>
    %10 = tpu.iota {dimensions = array<i32: 0>} : vector<64x256xi32>
    %11 = vector.broadcast %9 : vector<1x256xf32> to vector<64x256xf32>
    %12 = arith.cmpf oeq, %7, %11 : vector<64x256xf32>
    %c64_i32 = arith.constant 64 : i32
    %13 = vector.broadcast %c64_i32 : i32 to vector<64x256xi32>
    %14 = arith.select %12, %10, %13 : vector<64x256xi1>, vector<64x256xi32>
    %cst_9 = arith.constant dense<2147483647> : vector<256xi32>
    %15 = vector.multi_reduction <minsi>, %14, %cst_9 [0] : vector<64x256xi32> to vector<256xi32>
    %16 = vector.shape_cast %15 : vector<256xi32> to vector<1x256xi32>
    %17 = vector.broadcast %16 : vector<1x256xi32> to vector<64x256xi32>
    %18 = arith.cmpi eq, %14, %17 : vector<64x256xi32>
    %19 = arith.extui %18 : vector<64x256xi1> to vector<64x256xi32>
    %20 = arith.sitofp %19 : vector<64x256xi32> to vector<64x256xf32>
    %cst_10 = arith.constant dense<0.000000e+00> : vector<8x256xf32>
    %21 = tpu.matmul %3, %20, %cst_10 {dimension_numbers = #tpu.dot_dimension_numbers<[1], [0], [0], [1], [0, 0, 1, 1], [], []>} : vector<8x64xf32>, vector<64x256xf32>, vector<8x256xf32> -> vector<8x256xf32>
    %c0_11 = arith.constant 0 : index
    %c0_12 = arith.constant 0 : index
    %c0_13 = arith.constant 0 : index
    %22 = vector.load %arg7[%c0_11, %c0_12, %c0_13] : memref<1x8x256xf32, #tpu.memory_space<vmem>>, vector<1x8x256xf32>
    %23 = vector.shape_cast %22 : vector<1x8x256xf32> to vector<8x256xf32>
    %24 = vector.shape_cast %21 : vector<8x256xf32> to vector<1x8x256xf32>
    tpu.vector_store %arg7[%c0_11, %c0_12, %c0_13], %24 {strides = array<i32>} : memref<1x8x256xf32, #tpu.memory_space<vmem>>, vector<1x8x256xf32>,
    %c0_14 = arith.constant 0 : index
    %c0_15 = arith.constant 0 : index
    %c0_16 = arith.constant 0 : index
    %25 = vector.load %arg8[%c0_14, %c0_15, %c0_16] : memref<1x1x256xi32, #tpu.memory_space<vmem>>, vector<1x1x256xi32>
    %26 = vector.shape_cast %25 : vector<1x1x256xi32> to vector<1x256xi32>
    %27 = vector.shape_cast %16 : vector<1x256xi32> to vector<1x1x256xi32>
    tpu.vector_store %arg8[%c0_14, %c0_15, %c0_16], %27 {strides = array<i32>} : memref<1x1x256xi32, #tpu.memory_space<vmem>>, vector<1x1x256xi32>,
    %28 = arith.subf %21, %1 : vector<8x256xf32>
    %29 = arith.mulf %28, %28 : vector<8x256xf32>
    %cst_17 = arith.constant dense<0.000000e+00> : vector<256xf32>
    %30 = vector.multi_reduction <add>, %29, %cst_17 [0] : vector<8x256xf32> to vector<256xf32>
    %31 = vector.shape_cast %30 : vector<256xf32> to vector<1x256xf32>
    %c0_18 = arith.constant 0 : index
    %c0_19 = arith.constant 0 : index
    %c0_20 = arith.constant 0 : index
    %32 = vector.load %arg9[%c0_18, %c0_19, %c0_20] : memref<1x1x256xf32, #tpu.memory_space<vmem>>, vector<1x1x256xf32>
    %33 = vector.shape_cast %32 : vector<1x1x256xf32> to vector<1x256xf32>
    %34 = vector.shape_cast %31 : vector<1x256xf32> to vector<1x1x256xf32>
    tpu.vector_store %arg9[%c0_18, %c0_19, %c0_20], %34 {strides = array<i32>} : memref<1x1x256xf32, #tpu.memory_space<vmem>>, vector<1x1x256xf32>,
    return
  }
  func.func @transform_0(%arg0: i32, %arg1: i32, %arg2: i32) -> (i32, i32, i32) {
    %c0_i32 = arith.constant 0 : i32
    %c0_i32_0 = arith.constant 0 : i32
    return %arg0, %c0_i32, %arg1 : i32, i32, i32
  }
  func.func @transform_1(%arg0: i32, %arg1: i32, %arg2: i32) -> (i32, i32) {
    %c0_i32 = arith.constant 0 : i32
    %c0_i32_0 = arith.constant 0 : i32
    return %arg2, %c0_i32 : i32, i32
  }
  func.func @transform_2(%arg0: i32, %arg1: i32, %arg2: i32) -> (i32, i32) {
    %c0_i32 = arith.constant 0 : i32
    %c0_i32_0 = arith.constant 0 : i32
    return %c0_i32, %arg2 : i32, i32
  }
  func.func @transform_3(%arg0: i32, %arg1: i32, %arg2: i32) -> (i32, i32) {
    %c0_i32 = arith.constant 0 : i32
    %c0_i32_0 = arith.constant 0 : i32
    return %arg2, %c0_i32 : i32, i32
  }
  func.func @transform_4(%arg0: i32, %arg1: i32, %arg2: i32) -> (i32, i32, i32) {
    %c0_i32 = arith.constant 0 : i32
    %c0_i32_0 = arith.constant 0 : i32
    return %arg0, %c0_i32, %arg1 : i32, i32, i32
  }
  func.func @transform_5(%arg0: i32, %arg1: i32, %arg2: i32) -> (i32, i32, i32) {
    %c0_i32 = arith.constant 0 : i32
    %c0_i32_0 = arith.constant 0 : i32
    return %arg0, %c0_i32, %arg1 : i32, i32, i32
  }
  func.func @transform_6(%arg0: i32, %arg1: i32, %arg2: i32) -> (i32, i32, i32) {
    %c0_i32 = arith.constant 0 : i32
    %c0_i32_0 = arith.constant 0 : i32
    return %arg0, %c0_i32, %arg1 : i32, i32, i32
  }
}

</mosaic_0001>

<bundles_post_ra>
// kernel: vector_quantizer_forward.1
= control target key start
LH: loop header
LB: loop body
LE: loop exit
PB: predicated region body
PF: predicated region fallthrough
CT: control target
= control target key end

     0   :  { %12 = vsyncpa [#allocation3], 0  ;;  %s1696_s0 = inlined_call_operand.vmem [shape: f32[2,8,256], index: 0, kind: input, shape index: {}]   ;;  %s1697_s1 = inlined_call_operand.vmem [shape: f32[64,8], index: 1, kind: input, shape index: {}]   ;;  %s1698_s2 = inlined_call_operand.vmem [shape: f32[8,64], index: 2, kind: input, shape index: {}]   ;;  %s1699_s3 = inlined_call_operand.vmem [shape: f32[64,1], index: 3, kind: input, shape index: {}]   ;;  %s1700_s4 = inlined_call_operand.vmem [shape: f32[2,8,256], index: 4, kind: output, shape index: {0}]   ;;  %s1701_s5 = inlined_call_operand.hbm [shape: s32[2,1,256], index: 5, kind: output, shape index: {1}]   ;;  %s1702_s6 = inlined_call_operand.vmem [shape: f32[2,1,256], index: 6, kind: output, shape index: {2}]  }
   0x1   :  { %14 = vsyncpa [#allocation3 + $0x1], 0  ;;  %s1377_s21 = smov 0   ;;  %s1379_s22 = smov 0  }
   0x2   :  { %s1381_s23 = smov 0   ;;  %s1383_s24 = smov 0  }
   0x3   :  { %s1385_s25 = smov 0   ;;  %s1387_s26 = smov 0  }
   0x4 LB: > { %s1135_s27 = sadd.s32 4294967295, %s1335_s26   ;;  %s1136_s28 = sadd.s32 4294967294, %s1335_s26   ;;  %s1335_s26 = sphi %s1387_s26, %s20_s26   ;;  %s1331_s25 = sphi %s1385_s25, %s1711_s25   ;;  %s1327_s24 = sphi %s1383_s24, %s1710_s24   ;;  %s1323_s23 = sphi %s1381_s23, %s1709_s23   ;;  %s1319_s22 = sphi %s1379_s22, %s1708_s22   ;;  %s1315_s21 = sphi %s1377_s21, %s1707_s21  }
   0x5   : > { %s39_s29 = sadd.s32 1, %s1331_s25  ;;  %s182_s30 = sadd.s32 1, %s1323_s23 }
   0x6   : > { %p41_p0 = scmp.ge.s32.totalorder %s39_s29, 2  ;;  %p192_p1 = scmp.ne.s32.totalorder %s1323_s23, %s1319_s22 }
   0x7   : > { %p193_p2 = scmp.eq.s32.totalorder %s1135_s27, 1  ;;  %p198_p3 = scmp.ne.s32.totalorder %s1319_s22, %s1315_s21 }
   0x8   : > { %s1713_s29 = smov (%p41_p0, %s39_s29), 0  ;;  %p199_p5 = scmp.eq.s32.totalorder %s1136_s28, 1 }
   0x9   : > { %p1417_p4 = por %p193_p2, %p192_p1  ;;  %s177_s8 = ssub.s32 %s1331_s25, %s1713_s29 }
   0xa   : > { %p1142_p6 = scmp.ge.s32.totalorder %s1335_s26, 1  ;;  %p180_p7 = scmp.eq.s32.totalorder %s177_s8, 0 }
   0xb   : > { %p1424_p8 = por %p199_p5, %p198_p3  ;;  %p283_p9 = scmp.lt.s32.totalorder %s1335_s26, 3 }
   0xc   : > { %s1430_s10 = scalar_select %p180_p7, %s1323_s23, %s182_s30  }
   0xd   : > { %p284_p10 = pnand %p1142_p6, %p283_p9 }
   0xe   : > { %p349_p11 = scmp.lt.s32.totalorder (!%p284_p10), %s1327_s24, 1  ;;  %s335_s8 = sand.u32 (!%p284_p10), 1, %s1319_s22  }
   0xf   : > { %287 = sbr.rel (%p284_p10) target bundleno = 533 (0x215), region = 36  ;;  %s1615_s12 = sshll.u32 (!%p284_p10), %s335_s8, 1 }
  0x10   : > { %s337_s13 = scalar_lea.vmem (!%p284_p10), [#allocation2], %s1615_s12  ;;  %s1197_s17 = sshll.u32 (!%p284_p10), %s1327_s24, 5 }
  0x11   : > { %s936_s20 = scalar_lea.hbm (!%p284_p10), %s1701_s5, %s1197_s17  ;;  %s910_s28 = scalar_lea.sflag (!%p284_p10), [#allocation3], %s335_s8 }
  0x12   : > { %s1341_s12 = smov (!%p284_p10), [#allocation2]  }
  0x13   : > { %s1263_s14 = sshll.u32 (!%p284_p10), %s1341_s12, 4  ;;  %s1264_s14 = int_to_ptr.vmem [resolvable:$false] %s1263_s14 }
  0x14   : > { %v1337_v0 = vmov 0.0   ;;  %s1434_s11 = scalar_select %p349_p11, %s1327_s24, 1  ;;  %v1338_v1 = vmov 0   ;;  %v405_v2 = vld [vmem:[%s1699_s3] sm:$0xff]  ;;  %v407_v3 = vld [vmem:[%s1699_s3 + $0x10] sm:$0xff]  ;;  %v406_v4 = vld [vmem:[%s1699_s3 + $0x8] sm:$0xff] }
  0x15   : > { %502 = vmatprep.mubr.f32.mxu0 %v1337_v0  ;;  %836 = vmatprep.mubr.f32.mxu1 %v1337_v0  ;;  %v408_v5 = vld [vmem:[%s1699_s3 + $0x18] sm:$0xff]  ;;  %v396_v8 = vld [vmem:[%s1697_s1] sm:$0xff]  ;;  %vm413_vm0 = vcmask 64512   ;;  %v410_v10 = vld [vmem:[%s1699_s3 + $0x28] sm:$0xff]  ;;  %s1265_s15 = scalar_lea.vmem %s1264_s14, 64 }
  0x16   : > { %1257 = vset.pattern.permute.xlu0 %v1338_v1  ;;  %1258 = vset.pattern.permute.xlu1 %v1338_v1  ;;  %s1195_s16 = sshll.u32 %s1434_s11, 4  ;;  %v409_v9 = vld [vmem:[%s1699_s3 + $0x20] sm:$0xff]  ;;  %v397_v11 = vld [vmem:[%s1697_s1 + $0x8] sm:$0xff]  ;;  %v411_v12 = vld [vmem:[%s1699_s3 + $0x30] sm:$0xff] }
  0x17   : > { %553 = vperm.xlu0 %1257, %v405_v2   ;;  %563 = vperm.xlu1 %1258, %v407_v3   ;;  %s356_s27 = scalar_lea.vmem %s1696_s0, %s1195_s16  ;;  %v412_v13 = vld [vmem:[%s1699_s3 + $0x38] sm:$0xff]  ;;  %v398_v14 = vld [vmem:[%s1697_s1 + $0x10] sm:$0xff]  ;;  %v400_v16 = vld [vmem:[%s1697_s1 + $0x20] sm:$0xff] }
  0x18   : > { %v1454_v6 = vld [vmem:[%s356_s27 + $0x8] sm:$0xff]  ;;  %v1456_v7 = vld [vmem:[%s356_s27] sm:$0xff]  ;;  %v399_v15 = vld [vmem:[%s1697_s1 + $0x18] sm:$0xff]  ;;  %s938_s27 = sshll.u32 %s337_s13, 4  ;;  %s939_s27 = int_to_ptr.vmem [resolvable:$true] %s938_s27 }
  0x19   : > { %468 = vmatprep.subr.mxu0 %v1454_v6  ;;  %v401_v17 = vld [vmem:[%s1697_s1 + $0x28] sm:$0xff]  ;;  %v402_v18 = vld [vmem:[%s1697_s1 + $0x30] sm:$0xff]  ;;  %v403_v19 = vld [vmem:[%s1697_s1 + $0x38] sm:$0xff]  ;;  %s1259_s30 = scalar_lea.vmem %s939_s27, 32  ;;  %p1266_p1 = scmp.lt.s32.totalorder %s939_s27, %s1264_s14 }
  0x1a   : > { %469 = vmatpush1.msra.mxu0 %v1456_v7  ;;  %p1260_p12 = scmp.ne.s32.totalorder %s939_s27, %s1259_s30  ;;  %p1267_p2 = scmp.lt.s32.totalorder %s1265_s15, %s1259_s30 }
  0x1b   : > { %558 = vperm.xlu0 %1257, %v406_v4   ;;  %568 = vperm.xlu1 %1258, %v408_v5  }
  0x1c   : > { %1149 = vmatmul.mubr.msk.f32.vlgmr.msra.gmra.mxu0 %vm413_vm0, %v396_v8  ;;  %p1261_p13 = pnand %p1260_p12, %p1417_p4  ;;  %p1268_p3 = por %p1267_p2, %p1266_p1 }
  0x1d   : > { %508 = vmatprep.mubr.f32.mxu0 %v1337_v0 }
  0x1e   : > { %p1262_p0 = pneg %p1261_p13 }
  0x1f   : > { %573 = vperm.xlu0 %1257, %v409_v9   ;;  %578 = vperm.xlu1 %1258, %v410_v10  }
  0x20   : > { %1150 = vmatmul.mubr.msk.f32.gmra.mxu0 %vm413_vm0, %v397_v11  ;;  %p1269_p5 = pnand %p1268_p3, %p1262_p0 }
  0x21   : > { %514 = vmatprep.mubr.f32.mxu0 %v1337_v0 }
  0x23   : > { %583 = vperm.xlu0 %1257, %v411_v12   ;;  %588 = vperm.xlu1 %1258, %v412_v13  }
  0x24   : > { %1151 = vmatmul.mubr.msk.f32.gmra.mxu0 %vm413_vm0, %v398_v14  ;;  %v633_v14 = vlaneseq }
  0x25   : > { %520 = vmatprep.mubr.f32.mxu0 %v1337_v0 }
  0x28   : > { %1152 = vmatmul.mubr.msk.f32.gmra.mxu0 %vm413_vm0, %v399_v15 }
  0x29   : > { %526 = vmatprep.mubr.f32.mxu0 %v1337_v0 }
  0x2c   : > { %1153 = vmatmul.mubr.msk.f32.gmra.mxu0 %vm413_vm0, %v400_v16 }
  0x2d   : > { %532 = vmatprep.mubr.f32.mxu0 %v1337_v0 }
  0x30   : > { %1154 = vmatmul.mubr.msk.f32.gmra.mxu0 %vm413_vm0, %v401_v17 }
  0x31   : > { %538 = vmatprep.mubr.f32.mxu0 %v1337_v0 }
  0x34   : > { %1155 = vmatmul.mubr.msk.f32.gmra.mxu0 %vm413_vm0, %v402_v18 }
  0x35   : > { %544 = vmatprep.mubr.f32.mxu0 %v1337_v0 }
  0x38   : > { %1156 = vmatmul.mubr.msk.f32.gmra.mxu0 %vm413_vm0, %v403_v19  ;;  %v1538_v19 = vshrl.u32 %v633_v14, 7 }
  0x92   : > { %v554_v25 = vpop.permute.xlu0 %553  ;;  %v564_v26 = vpop.permute.xlu1 %563 }
  0x96   : > { %v559_v30 = vpop.permute.xlu0 %558  ;;  %v569_v31 = vpop.permute.xlu1 %568 }
  0x9a   : > { %v574_v34 = vpop.permute.xlu0 %573  ;;  %v579_v36 = vpop.permute.xlu1 %578 }
  0x9e   : > { %v584_v49 = vpop.permute.xlu0 %583  ;;  %v589_v58 = vpop.permute.xlu1 %588 }
  0xdc   : > { %v504_v20 = vpop.f32.mrf.mxu0 }
  0xdd   : > { %v591_v43 = vsub.f32 %v554_v25, %v504_v20 }
  0xde   : > { %v506_v21 = vpop.f32.mrf.mxu0 }
  0xdf   : > { %v1514_v47 = vsub.f32 %v554_v25, %v506_v21  ;;  %v636_v25 = vadd.s32 16, %v1538_v19 }
  0xe0   : > { %v510_v22 = vpop.f32.mrf.mxu0 }
  0xe1   : > { %v593_v44 = vsub.f32 %v559_v30, %v510_v22 }
  0xe2   : > { %v512_v23 = vpop.f32.mrf.mxu0 }
  0xe3   : > { %v1516_v48 = vsub.f32 %v559_v30, %v512_v23 }
  0xe4   : > { %v516_v24 = vpop.f32.mrf.mxu0 }
  0xe5   : > { %v1504_v38 = vsub.f32 %v564_v26, %v516_v24  ;;  %v635_v24 = vadd.s32 8, %v1538_v19 }
  0xe6   : > { %v518_v27 = vpop.f32.mrf.mxu0 }
  0xe7   : > { %v1508_v40 = vsub.f32 %v564_v26, %v518_v27  ;;  %v607_v52 = vmin.f32 %v591_v43, %v1504_v38  ;;  %v637_v26 = vadd.s32 24, %v1538_v19  ;;  %v638_v27 = vadd.s32 32, %v1538_v19 }
  0xe8   : > { %v522_v28 = vpop.f32.mrf.mxu0 }
  0xe9   : > { %v1506_v39 = vsub.f32 %v569_v31, %v522_v28  ;;  %v620_v56 = vmin.f32 %v1514_v47, %v1508_v40  ;;  %v639_v28 = vadd.s32 40, %v1538_v19 }
  0xea   : > { %v524_v29 = vpop.f32.mrf.mxu0 }
  0xeb   : > { %v1510_v41 = vsub.f32 %v569_v31, %v524_v29  ;;  %v608_v53 = vmin.f32 %v593_v44, %v1506_v39  ;;  %v640_v29 = vadd.s32 48, %v1538_v19  ;;  %v641_v31 = vadd.s32 56, %v1538_v19 }
  0xec   : > { %v528_v32 = vpop.f32.mrf.mxu0 }
  0xed   : > { %v599_v45 = vsub.f32 %v574_v34, %v528_v32  ;;  %v621_v57 = vmin.f32 %v1516_v48, %v1510_v41 }
  0xee   : > { %v530_v33 = vpop.f32.mrf.mxu0 }
  0xef   : > { %v1518_v50 = vsub.f32 %v574_v34, %v530_v33  ;;  %v609_v60 = vmin.f32 %v607_v52, %v599_v45 }
  0xf0   : > { %v534_v35 = vpop.f32.mrf.mxu0 }
  0xf1   : > { %v1512_v46 = vsub.f32 %v579_v36, %v534_v35  ;;  %v622_v0 = vmin.f32 %v620_v56, %v1518_v50 }
  0xf2   : > { %v536_v37 = vpop.f32.mrf.mxu0 }
  0xf3   : > { %v1522_v54 = vsub.f32 %v579_v36, %v536_v37  ;;  %v610_v61 = vmin.f32 %v608_v53, %v1512_v46 }
  0xf4   : > { %v540_v42 = vpop.f32.mrf.mxu0 }
  0xf5   : > { %v603_v55 = vsub.f32 %v584_v49, %v540_v42  ;;  %v623_v2 = vmin.f32 %v621_v57, %v1522_v54 }
  0xf6   : > { %v542_v51 = vpop.f32.mrf.mxu0 }
  0xf7   : > { %v1529_v62 = vsub.f32 %v584_v49, %v542_v51  ;;  %v611_v3 = vmin.f32 %v609_v60, %v603_v55 }
  0xf8   : > { %v546_v59 = vpop.f32.mrf.mxu0 }
  0xf9   : > { %v605_v63 = vsub.f32 %v589_v58, %v546_v59  ;;  %v624_v8 = vmin.f32 %v622_v0, %v1529_v62 }
  0xfa   : > { %v548_v1 = vpop.f32.mrf.mxu0 }
  0xfb   : > { %v612_v4 = vmin.f32 %v610_v61, %v605_v63  ;;  %v1533_v5 = vsub.f32 %v589_v58, %v548_v1 }
  0xfd   : > { %v613_v9 = vmin.f32 %v611_v3, %v612_v4  ;;  %v625_v10 = vmin.f32 %v623_v2, %v1533_v5 }
  0xff   : > { %v614_v11 = vrot.slane %v613_v9, 4  ;;  %v626_v12 = vmin.f32 %v624_v8, %v625_v10 }
 0x101   : > { %v615_v13 = vmin.f32 %v613_v9, %v614_v11  ;;  %v627_v15 = vrot.slane %v626_v12, 4  ;;  %v1339_v9 = vmov 1966171168  }
 0x102   : > { %v847_v10 = vunpack.c.l.s4 %v1339_v9 }
 0x103   : > { %v616_v16 = vrot.slane %v615_v13, 2  ;;  %v628_v17 = vmin.f32 %v626_v12, %v627_v15 }
 0x105   : > { %v617_v18 = vmin.f32 %v615_v13, %v616_v16  ;;  %v629_v20 = vrot.slane %v628_v17, 2  ;;  %v848_v13 = vunpack.c.0.s8 %v847_v10 }
 0x107   : > { %v618_v21 = vrot.slane %v617_v18, 1  ;;  %v630_v22 = vmin.f32 %v628_v17, %v629_v20  ;;  %v1610_v17 = vsub.s32 %v848_v13, %v1538_v19 }
 0x109   : > { %v619_v23 = vmin.f32 %v617_v18, %v618_v21  ;;  %v631_v30 = vrot.slane %v630_v22, 1  ;;  %v1340_v18 = vmov 1.0  }
 0x10b   : > { %vm642_vm1 = vcmp.eq.f32.partialorder %v591_v43, %v619_v23  ;;  %vm644_vm2 = vcmp.eq.f32.partialorder %v593_v44, %v619_v23  ;;  %vm646_vm3 = vcmp.eq.f32.partialorder %v1504_v38, %v619_v23  ;;  %vm648_vm4 = vcmp.eq.f32.partialorder %v1506_v39, %v619_v23 }
 0x10c   : > { %vm650_vm5 = vcmp.eq.f32.partialorder %v599_v45, %v619_v23  ;;  %vm652_vm6 = vcmp.eq.f32.partialorder %v1512_v46, %v619_v23  ;;  %vm654_vm7 = vcmp.eq.f32.partialorder %v603_v55, %v619_v23  ;;  %v1551_v32 = vsel %vm642_vm1, %v1538_v19, 64 }
 0x10d   : > { %v1553_v33 = vsel %vm644_vm2, %v635_v24, 64  ;;  %v1555_v34 = vsel %vm646_vm3, %v636_v25, 64  ;;  %v1557_v35 = vsel %vm648_vm4, %v637_v26, 64  ;;  %vm656_vm8 = vcmp.eq.f32.partialorder %v605_v63, %v619_v23 }
 0x10e   : > { %v1559_v36 = vsel %vm650_vm5, %v638_v27, 64  ;;  %vm674_vm9 = vcmp.lt.s32.totalorder %v1551_v32, %v1555_v34  ;;  %vm676_vm10 = vcmp.lt.s32.totalorder %v1553_v33, %v1557_v35  ;;  %v632_v37 = vmin.f32 %v630_v22, %v631_v30 }
 0x10f   : > { %v1565_v38 = vsel %vm652_vm6, %v639_v28, 64  ;;  %v1567_v39 = vsel %vm654_vm7, %v640_v29, 64  ;;  %v675_v42 = vsel %vm674_vm9, %v1551_v32, %v1555_v34  ;;  %v677_v43 = vsel %vm676_vm10, %v1553_v33, %v1557_v35 }
 0x110   : > { %v1573_v44 = vsel %vm656_vm8, %v641_v31, 64  ;;  %vm678_vm11 = vcmp.lt.s32.totalorder %v675_v42, %v1559_v36  ;;  %vm680_vm12 = vcmp.lt.s32.totalorder %v677_v43, %v1565_v38  ;;  %vm643_vm13 = vcmp.eq.f32.partialorder %v1514_v47, %v632_v37 }
 0x111   : > { %v679_v45 = vsel %vm678_vm11, %v675_v42, %v1559_v36  ;;  %v681_v46 = vsel %vm680_vm12, %v677_v43, %v1565_v38  ;;  %vm645_vm14 = vcmp.eq.f32.partialorder %v1516_v48, %v632_v37  ;;  %vm647_vm15 = vcmp.eq.f32.partialorder %v1508_v40, %v632_v37 }
 0x112   : > { %vm682_vm0 = vcmp.lt.s32.totalorder %v679_v45, %v1567_v39  ;;  %vm684_vm1 = vcmp.lt.s32.totalorder %v681_v46, %v1573_v44  ;;  %vm649_vm2 = vcmp.eq.f32.partialorder %v1510_v41, %v632_v37  ;;  %vm651_vm3 = vcmp.eq.f32.partialorder %v1518_v50, %v632_v37 }
 0x113   : > { %v683_v49 = vsel %vm682_vm0, %v679_v45, %v1567_v39  ;;  %v685_v51 = vsel %vm684_vm1, %v681_v46, %v1573_v44  ;;  %v1589_v47 = vsel %vm643_vm13, %v1538_v19, 64  ;;  %v1591_v52 = vsel %vm645_vm14, %v635_v24, 64 }
 0x114   : > { %vm686_vm4 = vcmp.lt.s32.totalorder %v683_v49, %v685_v51  ;;  %v1593_v48 = vsel %vm647_vm15, %v636_v25, 64  ;;  %vm653_vm5 = vcmp.eq.f32.partialorder %v1522_v54, %v632_v37  ;;  %v1596_v53 = vsel %vm649_vm2, %v637_v26, 64 }
 0x115   : > { %v687_v40 = vsel %vm686_vm4, %v683_v49, %v685_v51  ;;  %vm655_vm6 = vcmp.eq.f32.partialorder %v1529_v62, %v632_v37  ;;  %vm697_vm7 = vcmp.lt.s32.totalorder %v1589_v47, %v1593_v48  ;;  %vm657_vm8 = vcmp.eq.f32.partialorder %v1533_v5, %v632_v37 }
 0x116   : > { %v688_v41 = vrot.slane %v687_v40, 4  ;;  %v667_v50 = vsel %vm651_vm3, %v638_v27, 64  ;;  %v698_v55 = vsel %vm697_vm7, %v1589_v47, %v1593_v48  ;;  %vm699_vm9 = vcmp.lt.s32.totalorder %v1591_v52, %v1596_v53 }
 0x117   : > { %v669_v56 = vsel %vm653_vm5, %v639_v28, 64  ;;  %v700_v54 = vsel %vm699_vm9, %v1591_v52, %v1596_v53  ;;  %vm701_vm11 = vcmp.lt.s32.totalorder %v698_v55, %v667_v50  ;;  %v671_v58 = vsel %vm655_vm6, %v640_v29, 64 }
 0x118   : > { %vm689_vm10 = vcmp.lt.s32.totalorder %v687_v40, %v688_v41  ;;  %v702_v59 = vsel %vm701_vm11, %v698_v55, %v667_v50  ;;  %vm703_vm12 = vcmp.lt.s32.totalorder %v700_v54, %v669_v56  ;;  %v673_v61 = vsel %vm657_vm8, %v641_v31, 64 }
 0x119   : > { %v690_v57 = vsel %vm689_vm10, %v687_v40, %v688_v41  ;;  %v704_v62 = vsel %vm703_vm12, %v700_v54, %v669_v56  ;;  %vm705_vm13 = vcmp.lt.s32.totalorder %v702_v59, %v671_v58  ;;  %vm1621_vm11 = vcmp.lt.s32.totalorder %v633_v14, 256  ;;  %v404_v14 = vld [vmem:[%s1698_s2] sm:$0xff] }
 0x11a   : > { %v691_v60 = vrot.slane %v690_v57, 2  ;;  %v706_v63 = vsel %vm705_vm13, %v702_v59, %v671_v58  ;;  %vm707_vm14 = vcmp.lt.s32.totalorder %v704_v62, %v673_v61 }
 0x11b   : > { %v708_v0 = vsel %vm707_vm14, %v704_v62, %v673_v61 }
 0x11c   : > { %vm692_vm15 = vcmp.lt.s32.totalorder %v690_v57, %v691_v60  ;;  %vm709_vm0 = vcmp.lt.s32.totalorder %v706_v63, %v708_v0 }
 0x11d   : > { %v710_v1 = vsel %vm709_vm0, %v706_v63, %v708_v0  ;;  %v693_v2 = vsel %vm692_vm15, %v690_v57, %v691_v60 }
 0x11e   : > { %v711_v3 = vrot.slane %v710_v1, 4  ;;  %v694_v4 = vrot.slane %v693_v2, 1 }
 0x120   : > { %vm712_vm1 = vcmp.lt.s32.totalorder %v710_v1, %v711_v3  ;;  %vm695_vm3 = vcmp.lt.s32.totalorder %v693_v2, %v694_v4 }
 0x121   : > { %v713_v5 = vsel %vm712_vm1, %v710_v1, %v711_v3  ;;  %v696_v15 = vsel %vm695_vm3, %v693_v2, %v694_v4 }
 0x122   : > { %v714_v8 = vrot.slane %v713_v5, 2  ;;  %vm734_vm6 = vcmp.eq.s32.totalorder %v1573_v44, %v696_v15  ;;  %vm732_vm8 = vcmp.eq.s32.totalorder %v1567_v39, %v696_v15  ;;  %vm730_vm10 = vcmp.eq.s32.totalorder %v1565_v38, %v696_v15 }
 0x123   : > { %vm728_vm13 = vcmp.eq.s32.totalorder %v1559_v36, %v696_v15  ;;  %vm726_vm15 = vcmp.eq.s32.totalorder %v1557_v35, %v696_v15  ;;  %vm724_vm1 = vcmp.eq.s32.totalorder %v1555_v34, %v696_v15  ;;  %vm722_vm3 = vcmp.eq.s32.totalorder %v1553_v33, %v696_v15 }
 0x124   : > { %vm715_vm2 = vcmp.lt.s32.totalorder %v713_v5, %v714_v8 }
 0x125   : > { %v716_v11 = vsel %vm715_vm2, %v713_v5, %v714_v8 }
 0x126   : > { %v717_v12 = vrot.slane %v716_v11, 1 }
 0x128   : > { %vm718_vm4 = vcmp.lt.s32.totalorder %v716_v11, %v717_v12 }
 0x129   : > { %v719_v16 = vsel %vm718_vm4, %v716_v11, %v717_v12 }
 0x12a   : > { %vm735_vm5 = vcmp.eq.s32.totalorder %v673_v61, %v719_v16  ;;  %vm733_vm7 = vcmp.eq.s32.totalorder %v671_v58, %v719_v16  ;;  %v845_v20 = vcombine.low %v696_v15, %v719_v16  ;;  %vm731_vm9 = vcmp.eq.s32.totalorder %v669_v56, %v719_v16 }
 0x12b   : > { %1173 = vmatprep.subr.msk.mxu1 %vm735_vm5, %v1340_v18  ;;  %vm729_vm12 = vcmp.eq.s32.totalorder %v667_v50, %v719_v16  ;;  %vm727_vm14 = vcmp.eq.s32.totalorder %v1596_v53, %v719_v16  ;;  %vm725_vm0 = vcmp.eq.s32.totalorder %v1593_v48, %v719_v16  ;;  %vm723_vm2 = vcmp.eq.s32.totalorder %v1591_v52, %v719_v16 }
 0x12c   : > { %1174 = vmatpush1.msk.msra.mxu1 %vm734_vm6, %v1340_v18  ;;  %v852_v21 = vrot.slane %v845_v20, %v1610_v17  ;;  %vm721_vm4 = vcmp.eq.s32.totalorder %v1589_v47, %v719_v16  ;;  %vm768_vm5 = vcmask 523264   ;;  %vm720_vm6 = vcmp.eq.s32.totalorder %v1551_v32, %v696_v15 }
 0x12d   : > { %1175 = vmatprep.subr.msk.mxu1 %vm733_vm7, %v1340_v18 }
 0x12e   : > { %1176 = vmatpush1.msk.msra.mxu1 %vm732_vm8, %v1340_v18  ;;  %v859_v22 = vrot.slane %v852_v21, %v1610_v17 }
 0x12f   : > { %1177 = vmatprep.subr.msk.mxu1 %vm731_vm9, %v1340_v18 }
 0x130   : > { %1178 = vmatpush1.msk.msra.mxu1 %vm730_vm10, %v1340_v18  ;;  %864 = vst.msk [vmem:[%s337_s13] sm:$0x3] %vm1621_vm11, %v859_v22 }
 0x131   : > { %1179 = vmatprep.subr.msk.mxu1 %vm729_vm12, %v1340_v18 }
 0x132   : > { %1180 = vmatpush1.msk.msra.mxu1 %vm728_vm13, %v1340_v18 }
 0x133   : > { %1181 = vmatprep.subr.msk.mxu1 %vm727_vm14, %v1340_v18 }
 0x134   : > { %1182 = vmatpush1.msk.msra.mxu1 %vm726_vm15, %v1340_v18 }
 0x135   : > { %1183 = vmatprep.subr.msk.mxu1 %vm725_vm0, %v1340_v18 }
 0x136   : > { %1184 = vmatpush1.msk.msra.mxu1 %vm724_vm1, %v1340_v18 }
 0x137   : > { %1185 = vmatprep.subr.msk.mxu1 %vm723_vm2, %v1340_v18 }
 0x138   : > { %1186 = vmatpush1.msk.msra.mxu1 %vm722_vm3, %v1340_v18 }
 0x139   : > { %1187 = vmatprep.subr.msk.mxu1 %vm721_vm4, %v1340_v18 }
 0x13a   : > { %1188 = vmatpush1.msk.msra.mxu1 %vm720_vm6, %v1340_v18 }
 0x13b   : > { %1189 = vmatmul.mubr.msk.f32.vlgmr.msra.gmra.mxu1 %vm768_vm5, %v404_v14 }
 0x13c   : > { %1272 = shalt.err (!%p1269_p5)
}
 0x13d   : > { %s1273_s24 = scalar_lea.hbm %s936_s20, 32  ;;  %s1277_s17 = scalar_lea.hbm %s1701_s5, 64 }
 0x13e   : > { %p1274_p6 = scmp.ne.s32.totalorder %s936_s20, %s1273_s24  ;;  %p1278_p10 = scmp.lt.s32.totalorder %s936_s20, %s1701_s5 }
 0x13f   : > { %p1279_p11 = scmp.lt.s32.totalorder %s1277_s17, %s1273_s24 }
 0x140   : > { %p1275_p7 = pnand %p1274_p6, %p1417_p4 }
 0x141   : > { %p1280_p12 = por %p1279_p11, %p1278_p10 }
 0x142   : > { %p1276_p9 = pneg %p1275_p7 }
 0x144   : > { %p1281_p13 = pnand %p1280_p12, %p1276_p9 }
 0x146   : > { %1284 = shalt.err (!%p1281_p13)
}
 0x147   : > { %1198 = dma.vmem_to_hbm [thread:$0]  (%p1417_p4), %s939_s27, 32, %s936_s20, %s910_s28  }
 0x148   : > { %s382_s14 = scalar_lea.vmem %s1700_s4, %s1195_s16  ;;  %s1148_s7 = sshll.u32 %s1434_s11, 1 }
 0x149   : > { %s392_s27 = scalar_lea.vmem %s1702_s6, %s1148_s7 }
 0x1fb   : > { %v838_v23 = vpop.f32.mrf.mxu1 }
 0x1fc   : > { %v865_v24 = vsub.f32 %v838_v23, %v1456_v7  ;;  %843 = vst [vmem:[%s382_s14] sm:$0xff] %v838_v23 }
 0x1fd   : > { %v840_v25 = vpop.f32.mrf.mxu1 }
 0x1fe   : > { %v867_v26 = vmul.f32 %v865_v24, %v865_v24  ;;  %844 = vst [vmem:[%s382_s14 + $0x8] sm:$0xff] %v840_v25  ;;  %v866_v27 = vsub.f32 %v840_v25, %v1454_v6 }
 0x200   : > { %v869_v28 = vrot.slane %v867_v26, 4  ;;  %v868_v29 = vmul.f32 %v866_v27, %v866_v27 }
 0x202   : > { %v870_v30 = vadd.f32 %v869_v28, %v867_v26  ;;  %v875_v31 = vrot.slane %v868_v29, 4 }
 0x204   : > { %v871_v32 = vrot.slane %v870_v30, 2  ;;  %v876_v33 = vadd.f32 %v875_v31, %v868_v29 }
 0x206   : > { %v872_v34 = vadd.f32 %v871_v32, %v870_v30  ;;  %v877_v35 = vrot.slane %v876_v33, 2 }
 0x208   : > { %v873_v36 = vrot.slane %v872_v34, 1  ;;  %v878_v37 = vadd.f32 %v877_v35, %v876_v33 }
 0x20a   : > { %v879_v38 = vrot.slane %v878_v37, 1  ;;  %v874_v39 = vadd.f32 %v873_v36, %v872_v34 }
 0x20c   : > { %v880_v7 = vadd.f32 %v879_v38, %v878_v37 }
 0x20e   : > { %v883_v42 = vcombine.low %v874_v39, %v880_v7 }
 0x210   : > { %v890_v43 = vrot.slane %v883_v42, %v1610_v17 }
 0x212   : > { %v897_v6 = vrot.slane %v890_v43, %v1610_v17 }
 0x214   : > { %899 = vst.msk [vmem:[%s392_s27] sm:$0x3] %vm1621_vm11, %v897_v6 }
 0x215 PF: > { %p1204_p4 = scmp.ge.s32.totalorder %s1335_s26, 2  ;;  %s966_s28 = sand.u32 1, %s1315_s21  }
 0x216   : > { %s967_s11 = scalar_lea.sflag [#allocation3], %s966_s28 }
 0x217   : > { %p1201_p0 = pnand %p1204_p4, %p1424_p8 }
 0x219   : > { %p1202_p1 = pneg %p1201_p0 }
 0x21b   : > { %1310 = dma.done.wait (%p1202_p1), %s967_s11, 32  }
 0x21c   : > { %1312 = vsyncadd (%p1202_p1), %s967_s11, 4294967264  ;;  %s20_s26 = sadd.s32 1, %s1335_s26   ;;  %s1707_s21 = smov %s1319_s22 }
 0x21d   : > { %p17_p2 = scmp.ge.s32.totalorder %s20_s26, 4   ;;  %s1708_s22 = smov %s1323_s23 }
 0x21e   : > { %s1709_s23 = smov %s1430_s10  ;;  %s1710_s24 = smov %s1331_s25 }
 0x21f   : > { %s1711_s25 = smov %s1713_s29  ;;  %19 = sbr.rel (!%p17_p2) target bundleno = 4 (0x4), region = 104 }
 0x224   :  { %983 = vsyncpa [#allocation3], 1 }
 0x225   :  { %985 = vsyncpa [#allocation3 + $0x1], 1 }

</bundles_post_ra>
